<compile_context>
chip_gen: v7x
topology: tpu7x:2x2x1
jax: 0.10.0
libtpu: 0.0.40
codegen_flags: <defaults>
</compile_context>

<pallas_src>
import jax
import jax.numpy as jnp
from jax.experimental import pallas as pl
from jax.experimental.pallas import tpu as pltpu


def _round_up(v, m):
    return ((v + m - 1) // m) * m


def _sublane_multiple(dtype):
    # 8 for f32, 16 for bf16, 32 for int8/fp8 (sub-32-bit dtypes pack sublanes).
    return max(8, 256 // (jnp.dtype(dtype).itemsize * 8))


def weight_norm_scale(weight, weight_scale=1):
    """Per-output-row weight-norm scale, shape (1, Out), f32.

    Compute this ONCE whenever the weight changes (init / optimizer step) and
    pass it to linear_weight_norm(..., scale_row=...) so the per-call kernel
    never re-reads the full weight for the norm reduction.
    """
    w = weight.astype(jnp.float32)
    inv_norm = jax.lax.rsqrt(jnp.sum(w * w, axis=1, keepdims=True))          # (Out, 1)
    ws = jnp.asarray(weight_scale, jnp.float32).reshape(-1, 1)               # (Out,1) or (1,1)
    return (ws * inv_norm).reshape(1, -1)                                    # (1, Out)


def _lwn_kernel(x_ref, w_ref, s_ref, b_ref, o_ref, acc_ref):
    # K (reduction) axis is grid axis 2 (last, "arbitrary").
    @pl.when(pl.program_id(2) == 0)
    def _():
        acc_ref[...] = jnp.zeros_like(acc_ref)

    # MXU matmul: contract the last dim of both operands (no transpose),
    # native-dtype operands, f32 accumulation.
    acc_ref[...] += jax.lax.dot_general(
        x_ref[...], w_ref[...],
        dimension_numbers=(((1,), (1,)), ((), ())),
        preferred_element_type=jnp.float32)                                  # (block_b, block_out)

    @pl.when(pl.program_id(2) == pl.num_programs(2) - 1)
    def _():
        # Fused epilogue: per-column weight-norm scale + bias in one VPU pass.
        o_ref[...] = (acc_ref[...] * s_ref[...] + b_ref[...]).astype(o_ref.dtype)


def linear_weight_norm(x, weight, weight_scale=1, bias=None, *, scale_row=None,
                       block_b=None, block_out=None, block_k=None):
    """x: [B, In], weight: [Out, In], weight_scale: scalar or [Out, 1], bias: [Out]."""
    B, In = x.shape
    Out, In_w = weight.shape
    assert In == In_w

    # ---- Per-row scale / bias vectors (tiny, f32) -------------------------
    if scale_row is None:
        # Fallback: recomputed per call (extra Out*In HBM read). Prefer
        # precomputing once via weight_norm_scale() when the weight is reused.
        scale_row = weight_norm_scale(weight, weight_scale)
    scale_row = scale_row.astype(jnp.float32).reshape(1, Out)
    if bias is None:
        bias = jnp.zeros((Out,), jnp.float32)
    bias_row = bias.astype(jnp.float32).reshape(1, Out)

    x_itm = jnp.dtype(x.dtype).itemsize
    w_itm = jnp.dtype(weight.dtype).itemsize
    o_itm = x_itm

    # ---- Lane-aligned extents (only up to the next multiple of 128) -------
    In_p = _round_up(In, 128)
    Out_p = _round_up(Out, 128)

    # block_out: largest 128-multiple divisor of Out_p (<= 1024) -> no extra
    # padded-weight materialization beyond the 128 alignment.
    if block_out is None:
        cap = min(Out_p, 1024)
        block_out = max(d for d in range(128, cap + 1, 128) if Out_p % d == 0)

    # block_b: dtype-aware sublane alignment; up to 512 so the per-step weight
    # stream carries enough arithmetic intensity for the v6e/v7x MXU.
    sub = _sublane_multiple(x.dtype)
    B_sub = _round_up(B, sub)
    if block_b is None:
        block_b = min(B_sub, 512)
    B_p = _round_up(B_sub, block_b)

    # block_k: largest 128-multiple divisor of In_p whose double-buffered
    # footprint fits the VMEM budget (keeps v7x's 64 MiB safe for large In).
    VMEM_BUDGET = 40 * 1024 * 1024

    def _footprint(bk):
        return (2 * (block_b * bk * x_itm          # x tile (double-buffered)
                     + block_out * bk * w_itm      # weight tile
                     + 2 * block_out * 4           # scale + bias rows
                     + block_b * block_out * o_itm)  # output tile
                + block_b * block_out * 4)         # f32 accumulator scratch

    if block_k is None:
        block_k = 128
        for d in range(In_p, 127, -128):
            if In_p % d == 0 and _footprint(d) <= VMEM_BUDGET:
                block_k = d
                break
    vmem_limit = int(min(max(_footprint(block_k) * 1.4, 16 * 1024 * 1024),
                         64 * 1024 * 1024))

    # ---- Pad to the chosen extents (norm already computed on unpadded W) ---
    x_p = x
    if (B_p, In_p) != (B, In):
        x_p = jnp.zeros((B_p, In_p), x.dtype).at[:B, :In].set(x)
    w_p = weight
    if (Out_p, In_p) != (Out, In):
        w_p = jnp.zeros((Out_p, In_p), weight.dtype).at[:Out, :In].set(weight)
    s_p, b_p = scale_row, bias_row
    if Out_p != Out:
        # Padded columns get s = 0 and b = 0 -> exact zeros, sliced off below.
        s_p = jnp.zeros((1, Out_p), jnp.float32).at[:, :Out].set(scale_row)
        b_p = jnp.zeros((1, Out_p), jnp.float32).at[:, :Out].set(bias_row)

    n_b = B_p // block_b
    n_out = Out_p // block_out
    n_k = In_p // block_k

    # ---- Grid ordering: keep the larger operand resident -------------------
    # batch-slow: weight re-streamed n_b times, x streamed once.
    # out-slow:   x re-streamed n_out times, weight streamed once.
    w_total = Out_p * In_p * w_itm
    x_total = B_p * In_p * x_itm
    out_slow = (w_total + x_total * n_out) < (w_total * n_b + x_total)

    if out_slow:
        grid = (n_out, n_b, n_k)
        x_map = lambda j, i, k: (i, k)
        w_map = lambda j, i, k: (j, k)
        v_map = lambda j, i, k: (0, j)
        o_map = lambda j, i, k: (i, j)
    else:
        grid = (n_b, n_out, n_k)
        x_map = lambda i, j, k: (i, k)
        w_map = lambda i, j, k: (j, k)
        v_map = lambda i, j, k: (0, j)
        o_map = lambda i, j, k: (i, j)

    out_p = pl.pallas_call(
        _lwn_kernel,
        out_shape=jax.ShapeDtypeStruct((B_p, Out_p), x.dtype),
        grid_spec=pltpu.PrefetchScalarGridSpec(
            num_scalar_prefetch=0,
            grid=grid,
            in_specs=[
                pl.BlockSpec((block_b, block_k), x_map),       # x tile
                pl.BlockSpec((block_out, block_k), w_map),     # weight tile
                pl.BlockSpec((1, block_out), v_map),           # row scale
                pl.BlockSpec((1, block_out), v_map),           # bias
            ],
            out_specs=pl.BlockSpec((block_b, block_out), o_map),
            scratch_shapes=[pltpu.VMEM((block_b, block_out), jnp.float32)],
        ),
        compiler_params=pltpu.CompilerParams(
            # Both tile axes parallel (megacore / v7x dual-TC sharding),
            # reduction axis last and arbitrary.
            dimension_semantics=("parallel", "parallel", "arbitrary"),
            vmem_limit_bytes=vmem_limit),
    )(x_p, w_p, s_p, b_p)

    return out_p[:B, :Out]


def linear_weight_norm_ref(x, weight, weight_scale, bias):
    w = weight.astype(jnp.float32)
    norm = jnp.sqrt(jnp.sum(w * w, axis=1, keepdims=True))
    w_n = w * weight_scale.astype(jnp.float32) / norm
    y = jnp.dot(x.astype(jnp.float32), w_n.T,
                precision=jax.lax.Precision.HIGHEST) + bias.astype(jnp.float32)
    return y.astype(x.dtype)


if __name__ == "__main__":
    # Small config consistent with LinearWeightNorm(in_features, out_features).
    batch = 8
    in_features = 32
    out_features = 64
    weight_init_stdv = 0.1

    key = jax.random.PRNGKey(0)
    kx, kw = jax.random.split(key)

    # weight = randn(out, in) * weight_init_stdv ; bias = zeros(out)
    # weight_scale default (=1) represented as a ones [Out, 1] array.
    x = jax.random.normal(kx, (batch, in_features), dtype=jnp.float32)
    weight = jax.random.normal(kw, (out_features, in_features),
                               dtype=jnp.float32) * weight_init_stdv
    bias = jnp.zeros((out_features,), dtype=jnp.float32)
    weight_scale = jnp.ones((out_features, 1), dtype=jnp.float32)

    # Precompute the weight-norm scale once (done only when the weight changes).
    s_row = weight_norm_scale(weight, weight_scale)

    out = linear_weight_norm(x, weight, weight_scale, bias, scale_row=s_row)
    out = jax.block_until_ready(out)

    ref = linear_weight_norm_ref(x, weight, weight_scale, bias)
    assert out.shape == (batch, out_features)
    assert jnp.allclose(out, ref, rtol=1e-4, atol=1e-4), "mismatch vs reference"

    print("KERNEL_OK")
</pallas_src>

<mosaic_0001>
module attributes {stable_mosaic.version = 11 : i64} {
  func.func @_lwn_kernel(%arg0: i32, %arg1: i32, %arg2: i32, %arg3: memref<8x128xf32, #tpu.memory_space<vmem>>, %arg4: memref<128x128xf32, #tpu.memory_space<vmem>>, %arg5: memref<1x128xf32, #tpu.memory_space<vmem>>, %arg6: memref<1x128xf32, #tpu.memory_space<vmem>>, %arg7: memref<8x128xf32, #tpu.memory_space<vmem>>, %arg8: memref<8x128xf32, #tpu.memory_space<vmem>>) attributes {dimension_semantics = [#tpu.dimension_semantics<parallel>, #tpu.dimension_semantics<parallel>, #tpu.dimension_semantics<arbitrary>], iteration_bounds = array<i64: 1, 1, 1>, scalar_prefetch = 0 : i64, scratch_operands = 1 : i64, tpu.core_type = #tpu.core_type<tc>, window_params = [{transform_indices = @transform_0, window_bounds = array<i64: 8, 128>}, {transform_indices = @transform_1, window_bounds = array<i64: 128, 128>}, {transform_indices = @transform_2, window_bounds = array<i64: 1, 128>}, {transform_indices = @transform_3, window_bounds = array<i64: 1, 128>}, {transform_indices = @transform_4, window_bounds = array<i64: 8, 128>}]} {
    %c0_i32 = arith.constant 0 : i32
    %0 = arith.cmpi eq, %arg2, %c0_i32 : i32
    %1 = arith.extui %0 : i1 to i32
    %c0_i32_0 = arith.constant 0 : i32
    %2 = arith.cmpi ne, %1, %c0_i32_0 : i32
    scf.if %2 {
      %cst_10 = arith.constant 0.000000e+00 : f32
      %12 = vector.broadcast %cst_10 : f32 to vector<8x128xf32>
      %c0_11 = arith.constant 0 : index
      %c0_12 = arith.constant 0 : index
      %13 = vector.load %arg8[%c0_11, %c0_12] : memref<8x128xf32, #tpu.memory_space<vmem>>, vector<8x128xf32>
      tpu.vector_store %arg8[%c0_11, %c0_12], %12 {strides = array<i32>} : memref<8x128xf32, #tpu.memory_space<vmem>>, vector<8x128xf32>,
    } else {
    }
    %c0 = arith.constant 0 : index
    %c0_1 = arith.constant 0 : index
    %3 = vector.load %arg8[%c0, %c0_1] : memref<8x128xf32, #tpu.memory_space<vmem>>, vector<8x128xf32>
    %c0_2 = arith.constant 0 : index
    %c0_3 = arith.constant 0 : index
    %4 = vector.load %arg3[%c0_2, %c0_3] : memref<8x128xf32, #tpu.memory_space<vmem>>, vector<8x128xf32>
    %c0_4 = arith.constant 0 : index
    %c0_5 = arith.constant 0 : index
    %5 = vector.load %arg4[%c0_4, %c0_5] : memref<128x128xf32, #tpu.memory_space<vmem>>, vector<128x128xf32>
    %cst = arith.constant dense<0.000000e+00> : vector<8x128xf32>
    %6 = tpu.matmul %4, %5, %cst {dimension_numbers = #tpu.dot_dimension_numbers<[1], [1], [0], [0], [0, 0, 1, 0], [], []>} : vector<8x128xf32>, vector<128x128xf32>, vector<8x128xf32> -> vector<8x128xf32>
    %7 = arith.addf %3, %6 : vector<8x128xf32>
    %c0_6 = arith.constant 0 : index
    %c0_7 = arith.constant 0 : index
    %8 = vector.load %arg8[%c0_6, %c0_7] : memref<8x128xf32, #tpu.memory_space<vmem>>, vector<8x128xf32>
    tpu.vector_store %arg8[%c0_6, %c0_7], %7 {strides = array<i32>} : memref<8x128xf32, #tpu.memory_space<vmem>>, vector<8x128xf32>,
    %c0_i32_8 = arith.constant 0 : i32
    %9 = arith.cmpi eq, %arg2, %c0_i32_8 : i32
    %10 = arith.extui %9 : i1 to i32
    %c0_i32_9 = arith.constant 0 : i32
    %11 = arith.cmpi ne, %10, %c0_i32_9 : i32
    scf.if %11 {
      %c0_10 = arith.constant 0 : index
      %c0_11 = arith.constant 0 : index
      %12 = vector.load %arg8[%c0_10, %c0_11] : memref<8x128xf32, #tpu.memory_space<vmem>>, vector<8x128xf32>
      %c0_12 = arith.constant 0 : index
      %c0_13 = arith.constant 0 : index
      %13 = vector.load %arg5[%c0_12, %c0_13] : memref<1x128xf32, #tpu.memory_space<vmem>>, vector<1x128xf32>
      %14 = vector.broadcast %13 : vector<1x128xf32> to vector<8x128xf32>
      %15 = arith.mulf %12, %14 : vector<8x128xf32>
      %c0_14 = arith.constant 0 : index
      %c0_15 = arith.constant 0 : index
      %16 = vector.load %arg6[%c0_14, %c0_15] : memref<1x128xf32, #tpu.memory_space<vmem>>, vector<1x128xf32>
      %17 = vector.broadcast %16 : vector<1x128xf32> to vector<8x128xf32>
      %18 = arith.addf %15, %17 : vector<8x128xf32>
      %c0_16 = arith.constant 0 : index
      %c0_17 = arith.constant 0 : index
      %19 = vector.load %arg7[%c0_16, %c0_17] : memref<8x128xf32, #tpu.memory_space<vmem>>, vector<8x128xf32>
      tpu.vector_store %arg7[%c0_16, %c0_17], %18 {strides = array<i32>} : memref<8x128xf32, #tpu.memory_space<vmem>>, vector<8x128xf32>,
    } else {
    }
    return
  }
  func.func @transform_0(%arg0: i32, %arg1: i32, %arg2: i32) -> (i32, i32) {
    %c0_i32 = arith.constant 0 : i32
    return %arg0, %arg2 : i32, i32
  }
  func.func @transform_1(%arg0: i32, %arg1: i32, %arg2: i32) -> (i32, i32) {
    %c0_i32 = arith.constant 0 : i32
    return %arg1, %arg2 : i32, i32
  }
  func.func @transform_2(%arg0: i32, %arg1: i32, %arg2: i32) -> (i32, i32) {
    %c0_i32 = arith.constant 0 : i32
    %c0_i32_0 = arith.constant 0 : i32
    return %c0_i32, %arg1 : i32, i32
  }
  func.func @transform_3(%arg0: i32, %arg1: i32, %arg2: i32) -> (i32, i32) {
    %c0_i32 = arith.constant 0 : i32
    %c0_i32_0 = arith.constant 0 : i32
    return %c0_i32, %arg1 : i32, i32
  }
  func.func @transform_4(%arg0: i32, %arg1: i32, %arg2: i32) -> (i32, i32) {
    %c0_i32 = arith.constant 0 : i32
    return %arg0, %arg1 : i32, i32
  }
}

</mosaic_0001>

<bundles_post_ra>
// kernel: tpu_custom_call.1
= control target key start
LH: loop header
LB: loop body
LE: loop exit
PB: predicated region body
PF: predicated region fallthrough
CT: control target
= control target key end

     0   :  { %9 = vsyncpa [#allocation4], 0  ;;  %s416_s0 = inlined_call_operand.hbm [shape: f32[8,128], index: 0, kind: input, shape index: {}]   ;;  %s417_s1 = inlined_call_operand.hbm [shape: f32[128,128], index: 1, kind: input, shape index: {}]   ;;  %s418_s2 = inlined_call_operand.vmem [shape: f32[1,128], index: 2, kind: input, shape index: {}]   ;;  %s419_s3 = inlined_call_operand.vmem [shape: f32[1,128], index: 3, kind: input, shape index: {}]   ;;  %s420_s4 = inlined_call_operand.hbm [shape: f32[8,128], index: 4, kind: output, shape index: {}]  }
   0x1   :  { %10 = vsyncpa [#allocation7], 0 }
   0x2   :  { %11 = vsyncpa [#allocation5], 0  ;;  %s334_s15 = smov [#allocation3]   ;;  %s335_s17 = smov [#allocation6]  }
   0x3   :  { %s18_s16 = sshll.u32 %s334_s15, 4  ;;  %s27_s18 = sshll.u32 %s335_s17, 4  ;;  %s19_s16 = int_to_ptr.vmem [resolvable:$true] %s18_s16  ;;  %s367_s18 = int_to_ptr.vmem [resolvable:$true] %s27_s18 }
   0x4   :  { %s262_s21 = scalar_lea.hbm %s416_s0, 128 }
   0x5   :  { %p263_p0 = scmp.ne.s32.totalorder %s416_s0, %s262_s21  ;;  %p266_p1 = scmp.lt.u32.totalorder %s262_s21, %s416_s0 }
   0x7   :  { %p268_p2 = pnand %p266_p1, %p263_p0 }
   0x9   :  { %271 = shalt.err (!%p268_p2)
}
   0xa   :  { %s272_s26 = scalar_lea.vmem %s19_s16, 128  ;;  %p277_p4 = scmp.lt.s32.totalorder %s19_s16, %s19_s16 }
   0xb   :  { %p273_p3 = scmp.ne.s32.totalorder %s19_s16, %s272_s26  ;;  %p278_p5 = scmp.lt.s32.totalorder %s272_s26, %s272_s26 }
   0xd   :  { %p279_p6 = por %p278_p5, %p277_p4 }
   0xf   :  { %p280_p7 = pnand %p279_p6, %p273_p3 }
  0x11   :  { %283 = shalt.err (!%p280_p7)
}
  0x12   :  { %21 = dma.hbm_to_vmem [thread:$0]  %s416_s0, 128, %s19_s16, [#allocation4]  }
  0x13   :  { %s284_s5 = scalar_lea.hbm %s417_s1, 2048 }
  0x14   :  { %p285_p8 = scmp.ne.s32.totalorder %s417_s1, %s284_s5  ;;  %p288_p9 = scmp.lt.u32.totalorder %s284_s5, %s417_s1 }
  0x16   :  { %p290_p10 = pnand %p288_p9, %p285_p8 }
  0x18   :  { %293 = shalt.err (!%p290_p10)
}
  0x19   :  { %s294_s10 = scalar_lea.vmem %s367_s18, 2048  ;;  %p299_p12 = scmp.lt.s32.totalorder %s367_s18, %s367_s18 }
  0x1a   :  { %p295_p11 = scmp.ne.s32.totalorder %s367_s18, %s294_s10  ;;  %p300_p13 = scmp.lt.s32.totalorder %s294_s10, %s294_s10 }
  0x1c   :  { %p301_p0 = por %p300_p13, %p299_p12 }
  0x1e   :  { %p302_p1 = pnand %p301_p0, %p295_p11 }
  0x20   :  { %305 = shalt.err (!%p302_p1)
}
  0x21   :  { %s336_s0 = smov 128   ;;  %s337_s11 = smov 8  }
  0x22   :  { %33 = dma.hbm_to_vmem [thread:$0]  %s417_s1, 2048, %s367_s18, [#allocation7], %s336_s0, %s336_s0, %s337_s11  }
  0x23   :  { %328 = dma.done.wait [#allocation4], 128  }
  0x24   :  { %329 = vsyncadd [#allocation4], 4294967168 }
  0x25   :  { %330 = dma.done.wait [#allocation7], 2048  }
  0x26   :  { %331 = vsyncadd [#allocation7], 4294965248  ;;  %v338_v0 = vmov 0.0|0.0   ;;  %vm339_vm0 = vmmov 0   ;;  %v340_v1 = vmov 0.0   ;;  %v51_v2 = vld [vmem:[#allocation6] sm:$0xff] }
  0x27   :  { %230 = vmatprep.subr.bf16.mxu0 %v338_v0  ;;  %227 = vmatprep.mubr.msk.f32.mxu0 %vm339_vm0, %v340_v1  ;;  %v52_v3 = vld [vmem:[#allocation6 + $0x8] sm:$0xff]  ;;  %v53_v5 = vld [vmem:[#allocation6 + $0x10] sm:$0xff]  ;;  %v54_v6 = vld [vmem:[#allocation6 + $0x18] sm:$0xff]  ;;  %s341_s17 = smov [#allocation8]  }
  0x28   :  { %v231_v4 = vpack.c.bf16 %v52_v3, %v51_v2  ;;  %v234_v7 = vpack.c.bf16 %v54_v6, %v53_v5  ;;  %v55_v8 = vld [vmem:[#allocation6 + $0x20] sm:$0xff]  ;;  %v56_v9 = vld [vmem:[#allocation6 + $0x28] sm:$0xff]  ;;  %v57_v11 = vld [vmem:[#allocation6 + $0x30] sm:$0xff]  ;;  %s166_s18 = sshll.u32 %s341_s17, 4  ;;  %s167_s18 = int_to_ptr.vmem [resolvable:$true] %s166_s18 }
  0x29   :  { %v237_v10 = vpack.c.bf16 %v56_v9, %v55_v8  ;;  %v58_v12 = vld [vmem:[#allocation6 + $0x38] sm:$0xff]  ;;  %v59_v14 = vld [vmem:[#allocation6 + $0x40] sm:$0xff]  ;;  %v60_v15 = vld [vmem:[#allocation6 + $0x48] sm:$0xff]  ;;  %s306_s19 = scalar_lea.vmem %s167_s18, 128  ;;  %p311_p3 = scmp.lt.s32.totalorder %s167_s18, %s167_s18 }
  0x2a   :  { %232 = vmatpush3.bf16.xpose.msra.mxu0 %v231_v4  ;;  %v240_v13 = vpack.c.bf16 %v58_v12, %v57_v11  ;;  %v243_v16 = vpack.c.bf16 %v60_v15, %v59_v14  ;;  %v61_v17 = vld [vmem:[#allocation6 + $0x50] sm:$0xff]  ;;  %v62_v18 = vld [vmem:[#allocation6 + $0x58] sm:$0xff]  ;;  %v63_v20 = vld [vmem:[#allocation6 + $0x60] sm:$0xff]  ;;  %p307_p2 = scmp.ne.s32.totalorder %s167_s18, %s306_s19  ;;  %p312_p4 = scmp.lt.s32.totalorder %s306_s19, %s306_s19 }
  0x2b   :  { %233 = vmatprep.subr.bf16.mxu0 %v338_v0  ;;  %v246_v19 = vpack.c.bf16 %v62_v18, %v61_v17  ;;  %v64_v21 = vld [vmem:[#allocation6 + $0x68] sm:$0xff]  ;;  %v65_v23 = vld [vmem:[#allocation6 + $0x70] sm:$0xff]  ;;  %v66_v24 = vld [vmem:[#allocation6 + $0x78] sm:$0xff] }
  0x2c   :  { %v249_v22 = vpack.c.bf16 %v64_v21, %v63_v20  ;;  %v252_v25 = vpack.c.bf16 %v66_v24, %v65_v23  ;;  %v50_v26 = vld [vmem:[#allocation3] sm:$0xff]  ;;  %p313_p5 = por %p312_p4, %p311_p3 }
  0x2d   :  { %v176_v27 = vld [vmem:[%s418_s2] ss:$0 sm:$0xff] }
  0x2e   :  { %v177_v29 = vld [vmem:[%s419_s3] ss:$0 sm:$0xff]  ;;  %p314_p6 = pnand %p313_p5, %p307_p2 }
  0x32   :  { %235 = vmatpush3.bf16.xpose.msra.mxu0 %v234_v7 }
  0x33   :  { %236 = vmatprep.subr.bf16.mxu0 %v338_v0 }
  0x3a   :  { %238 = vmatpush3.bf16.xpose.msra.mxu0 %v237_v10 }
  0x3b   :  { %239 = vmatprep.subr.bf16.mxu0 %v338_v0 }
  0x42   :  { %241 = vmatpush3.bf16.xpose.msra.mxu0 %v240_v13 }
  0x43   :  { %242 = vmatprep.subr.bf16.mxu0 %v338_v0 }
  0x4a   :  { %244 = vmatpush3.bf16.xpose.msra.mxu0 %v243_v16 }
  0x4b   :  { %245 = vmatprep.subr.bf16.mxu0 %v338_v0 }
  0x52   :  { %247 = vmatpush3.bf16.xpose.msra.mxu0 %v246_v19 }
  0x53   :  { %248 = vmatprep.subr.bf16.mxu0 %v338_v0 }
  0x5a   :  { %250 = vmatpush3.bf16.xpose.msra.mxu0 %v249_v22 }
  0x5b   :  { %251 = vmatprep.subr.bf16.mxu0 %v338_v0 }
  0x62   :  { %253 = vmatpush3.bf16.xpose.msra.mxu0 %v252_v25 }
  0x69   :  { %228 = vmatmul.mubr.f32.vlgmr.msra.gmra.mrb[0].mxu0 %v50_v26 }
 0x13c   :  { %v133_v28 = vpop.f32.mrb[0].mxu0 }
 0x13d   :  { %v150_v30 = vmul.f32 %v176_v27, %v133_v28  ;;  %v229_v31 = vpop.f32.mrb[1].mxu0 }
 0x13f   :  { %v158_v32 = vadd.f32 %v177_v29, %v150_v30 }
 0x141   :  { %159 = vst [vmem:[#allocation8] sm:$0xff] %v158_v32 }
 0x142   :  { %317 = shalt.err (!%p314_p6)
}
 0x143   :  { %s318_s21 = scalar_lea.hbm %s420_s4, 128 }
 0x144   :  { %p319_p7 = scmp.ne.s32.totalorder %s420_s4, %s318_s21  ;;  %p322_p8 = scmp.lt.u32.totalorder %s318_s21, %s420_s4 }
 0x146   :  { %p324_p9 = pnand %p322_p8, %p319_p7 }
 0x148   :  { %327 = shalt.err (!%p324_p9)
}
 0x149   :  { %169 = dma.vmem_to_hbm [thread:$0]  %s167_s18, 128, %s420_s4, [#allocation5]  }
 0x14a   :  { %332 = dma.done.wait [#allocation5], 128  }
 0x14b   :  { %333 = vsyncadd [#allocation5], 4294967168 }
 0x14c   :  { %173 = vsyncpa [#allocation4], 1 }
 0x14d   :  { %174 = vsyncpa [#allocation7], 1 }
 0x14e   :  { %175 = vsyncpa [#allocation5], 1 }

</bundles_post_ra>
